<compile_context>
chip_gen: v5e
topology: v5e:2x2
jax: 0.10.0
libtpu: 0.0.40
codegen_flags: <defaults>
</compile_context>

<pallas_src>
import functools

import jax
import jax.numpy as jnp
from jax.experimental import pallas as pl
from jax.experimental.pallas import tpu as pltpu


def _mean_all(x):
    """Mean of a 2-D array, returned as a (1, 1) array (everything stays >= 2-D)."""
    s = jnp.sum(x, axis=1, keepdims=True)
    s = jnp.sum(s, axis=0, keepdims=True)
    return s * (1.0 / float(x.shape[0] * x.shape[1]))


def _entropy_mean(x, axis):
    """mean (over the other axis) of the entropy of softmax(x) taken along `axis`.

    H = -sum p log p = logsumexp(x) - sum(exp(x - m) * x) / sum(exp(x - m)).
    Returns a (1, 1) array.
    """
    m = jnp.max(x, axis=axis, keepdims=True)
    e = jnp.exp(x - m)
    s = jnp.sum(e, axis=axis, keepdims=True)
    lse = m + jnp.log(s)
    h = lse - jnp.sum(e * x, axis=axis, keepdims=True) / s
    return _mean_all(h)


def _scae_loss_kernel(scal_ref, a_kn_ref, g_ref, ak_t_ref, o_ref, *, batch):
    # scal_ref : (1, 4) f32  = [img_lik, part_lik, b_c, k_c]
    # a_kn_ref : (B, K, N) f32
    # g_ref    : (B, K, N) f32  (gaussian)
    # ak_t_ref : (K, B) f32     (a_k.squeeze(-1) transposed)
    # o_ref    : (1, 1) f32
    scal = scal_ref[...]                       # (1, 4)
    img_lik = scal[:, 0:1]                     # (1, 1)
    part_lik = scal[:, 1:2]
    b_c = scal[:, 2:3]
    k_c = scal[:, 3:4]

    ak_t = ak_t_ref[...]                       # (K, B)

    # Per-batch-element reductions over the part axis N (lane reductions),
    # assembled as (K, B) matrices. `batch` is static -> unrolled.
    max_cols = []
    sag_cols = []
    for b in range(batch):
        a_b = a_kn_ref[b]                      # (K, N)
        g_b = g_ref[b]                         # (K, N)
        max_cols.append(jnp.max(a_b, axis=1, keepdims=True))          # (K, 1)
        sag_cols.append(jnp.sum(a_b * g_b, axis=1, keepdims=True))    # (K, 1)
    akn_max_t = jnp.concatenate(max_cols, axis=1)    # (K, B) == a_kn.max(-1).T
    sag_t = jnp.concatenate(sag_cols, axis=1)        # (K, B) == (a_kn*gaussian).sum(-1).T

    # a_k_prior and a_kn_posterior.sum(-1), both in transposed (K, B) layout.
    prior_t = ak_t * akn_max_t                 # prior_t[k, b] == a_k_prior[b, k]
    v_t = ak_t * sag_t                         # v_t == v_k ;  v_t.T == v_b

    # Prior sparsity.
    sum_over_k = jnp.sum(prior_t, axis=0, keepdims=True)   # (1, B) = a_k_prior.sum(-1)
    sum_over_b = jnp.sum(prior_t, axis=1, keepdims=True)   # (K, 1) = a_k_prior.sum(0)
    l_11 = _mean_all((sum_over_k - k_c) ** 2)
    l_12 = _mean_all((sum_over_b - b_c) ** 2)

    # Posterior sparsity: entropy(v_k) - entropy(v_b).
    ent_vk = _entropy_mean(v_t, axis=1)        # softmax over B for each capsule k
    ent_vb = _entropy_mean(v_t, axis=0)        # softmax over K for each batch elem b

    loss = -img_lik - part_lik + (l_11 + l_12) + 10.0 * (ent_vk - ent_vb)
    o_ref[...] = loss.astype(o_ref.dtype)


def scae_loss_forward(output_scae, b_c, k_c):
    """Pallas implementation of SCAE_LOSS.forward. Returns a scalar (shape ())."""
    img_lik, part_lik, a_k, a_kn, gaussian = output_scae
    B, K, N = a_kn.shape

    a_kn = a_kn.astype(jnp.float32)
    gaussian = gaussian.astype(jnp.float32)
    # Wrapper-side layout plumbing (free in XLA): a_k as a (K, B) matrix.
    ak_t = jnp.transpose(a_k.reshape(B, K)).astype(jnp.float32)
    scalars = jnp.stack([
        jnp.asarray(img_lik, dtype=jnp.float32),
        jnp.asarray(part_lik, dtype=jnp.float32),
        jnp.asarray(b_c, dtype=jnp.float32),
        jnp.asarray(k_c, dtype=jnp.float32),
    ]).reshape(1, 4)

    kernel = functools.partial(_scae_loss_kernel, batch=B)

    out = pl.pallas_call(
        kernel,
        out_shape=jax.ShapeDtypeStruct((1, 1), jnp.float32),
        grid_spec=pltpu.PrefetchScalarGridSpec(
            num_scalar_prefetch=0,
            grid=(1,),
            in_specs=[
                pl.BlockSpec((1, 4), lambda i: (0, 0)),        # packed scalars
                pl.BlockSpec((B, K, N), lambda i: (0, 0, 0)),  # a_kn
                pl.BlockSpec((B, K, N), lambda i: (0, 0, 0)),  # gaussian
                pl.BlockSpec((K, B), lambda i: (0, 0)),        # a_k^T
            ],
            out_specs=pl.BlockSpec((1, 1), lambda i: (0, 0)),
        ),
        compiler_params=pltpu.CompilerParams(
            dimension_semantics=("arbitrary",)),
    )(scalars, a_kn, gaussian, ak_t)
    return out[0, 0]


def scae_loss_reference(output_scae, b_c, k_c):
    """Pure-JAX mirror of the PyTorch SCAE_LOSS.forward."""
    img_lik, part_lik, a_k, a_kn, gaussian = output_scae

    def entropy(x):
        p = jax.nn.softmax(x, axis=-1)
        logp = jax.nn.log_softmax(x, axis=-1)
        return jnp.mean(-jnp.sum(p * logp, axis=-1))

    a_k_prior = a_k.squeeze(-1) * a_kn.max(-1)                # (B, K)
    a_kn_posterior = a_k * (a_kn * gaussian)                  # (B, K, N)
    l_11 = jnp.mean((a_k_prior.sum(-1) - k_c) ** 2)
    l_12 = jnp.mean((a_k_prior.sum(0) - b_c) ** 2)
    prior_sparsity = l_11 + l_12
    v_b = a_kn_posterior.sum(-1)                              # (B, K)
    v_k = v_b.T                                               # (K, B)
    posterior_sparsity = entropy(v_k) - entropy(v_b)
    return -img_lik - part_lik + prior_sparsity + 10.0 * posterior_sparsity


if __name__ == "__main__":
    B, K, N = 8, 16, 32     # batch, capsules, parts

    key = jax.random.PRNGKey(0)
    k1, k2, k3, k4, k5 = jax.random.split(key, 5)
    img_lik = jax.random.normal(k1, (), dtype=jnp.float32) * 10.0
    part_lik = jax.random.normal(k2, (), dtype=jnp.float32) * 10.0
    a_k = jax.nn.sigmoid(jax.random.normal(k3, (B, K, 1), dtype=jnp.float32))
    a_kn = jax.nn.sigmoid(jax.random.normal(k4, (B, K, N), dtype=jnp.float32))
    gaussian = jnp.exp(-0.5 * jax.random.normal(k5, (B, K, N), dtype=jnp.float32) ** 2)
    b_c, k_c = 2.0, 3.0

    output_scae = (img_lik, part_lik, a_k, a_kn, gaussian)

    out = scae_loss_forward(output_scae, b_c, k_c)
    out = jax.block_until_ready(out)

    ref = scae_loss_reference(output_scae, b_c, k_c)
    assert out.shape == ()
    assert jnp.allclose(out, ref, atol=1e-3, rtol=1e-4), (out, ref)

    print("KERNEL_OK")
</pallas_src>

<mosaic_0001>
module attributes {stable_mosaic.version = 11 : i64} {
  func.func @_scae_loss_kernel(%arg0: i32, %arg1: memref<1x4xf32, #tpu.memory_space<vmem>>, %arg2: memref<8x16x32xf32, #tpu.memory_space<vmem>>, %arg3: memref<8x16x32xf32, #tpu.memory_space<vmem>>, %arg4: memref<16x8xf32, #tpu.memory_space<vmem>>, %arg5: memref<1x1xf32, #tpu.memory_space<vmem>>) attributes {dimension_semantics = [#tpu.dimension_semantics<arbitrary>], iteration_bounds = array<i64: 1>, scalar_prefetch = 0 : i64, scratch_operands = 0 : i64, tpu.core_type = #tpu.core_type<tc>, window_params = [{pipeline_mode = #tpu.pipeline_mode<synchronous>, transform_indices = @transform_0, window_bounds = array<i64: 1, 4>}, {pipeline_mode = #tpu.pipeline_mode<synchronous>, transform_indices = @transform_1, window_bounds = array<i64: 8, 16, 32>}, {pipeline_mode = #tpu.pipeline_mode<synchronous>, transform_indices = @transform_2, window_bounds = array<i64: 8, 16, 32>}, {pipeline_mode = #tpu.pipeline_mode<synchronous>, transform_indices = @transform_3, window_bounds = array<i64: 16, 8>}, {pipeline_mode = #tpu.pipeline_mode<synchronous>, transform_indices = @transform_4, window_bounds = array<i64: 1, 1>}]} {
    %c0 = arith.constant 0 : index
    %c0_0 = arith.constant 0 : index
    %0 = vector.load %arg1[%c0, %c0_0] : memref<1x4xf32, #tpu.memory_space<vmem>>, vector<1x4xf32>
    %1 = vector.extract_strided_slice %0 {offsets = [0, 0], sizes = [1, 1], strides = [1, 1]} : vector<1x4xf32> to vector<1x1xf32>
    %2 = vector.extract_strided_slice %0 {offsets = [0, 1], sizes = [1, 1], strides = [1, 1]} : vector<1x4xf32> to vector<1x1xf32>
    %3 = vector.extract_strided_slice %0 {offsets = [0, 2], sizes = [1, 1], strides = [1, 1]} : vector<1x4xf32> to vector<1x1xf32>
    %4 = vector.extract_strided_slice %0 {offsets = [0, 3], sizes = [1, 1], strides = [1, 1]} : vector<1x4xf32> to vector<1x1xf32>
    %c0_1 = arith.constant 0 : index
    %c0_2 = arith.constant 0 : index
    %5 = vector.load %arg4[%c0_1, %c0_2] : memref<16x8xf32, #tpu.memory_space<vmem>>, vector<16x8xf32>
    %c0_3 = arith.constant 0 : index
    %c0_4 = arith.constant 0 : index
    %c0_5 = arith.constant 0 : index
    %6 = vector.load %arg2[%c0_3, %c0_4, %c0_5] : memref<8x16x32xf32, #tpu.memory_space<vmem>>, vector<1x16x32xf32>
    %7 = vector.shape_cast %6 : vector<1x16x32xf32> to vector<16x32xf32>
    %c0_6 = arith.constant 0 : index
    %c0_7 = arith.constant 0 : index
    %c0_8 = arith.constant 0 : index
    %8 = vector.load %arg3[%c0_6, %c0_7, %c0_8] : memref<8x16x32xf32, #tpu.memory_space<vmem>>, vector<1x16x32xf32>
    %9 = vector.shape_cast %8 : vector<1x16x32xf32> to vector<16x32xf32>
    %cst = arith.constant dense<0xFF800000> : vector<16xf32>
    %10 = vector.multi_reduction <maximumf>, %7, %cst [1] : vector<16x32xf32> to vector<16xf32>
    %11 = vector.shape_cast %10 : vector<16xf32> to vector<16x1xf32>
    %12 = arith.mulf %7, %9 : vector<16x32xf32>
    %cst_9 = arith.constant dense<0.000000e+00> : vector<16xf32>
    %13 = vector.multi_reduction <add>, %12, %cst_9 [1] : vector<16x32xf32> to vector<16xf32>
    %14 = vector.shape_cast %13 : vector<16xf32> to vector<16x1xf32>
    %c1 = arith.constant 1 : index
    %c0_10 = arith.constant 0 : index
    %c0_11 = arith.constant 0 : index
    %15 = vector.load %arg2[%c1, %c0_10, %c0_11] : memref<8x16x32xf32, #tpu.memory_space<vmem>>, vector<1x16x32xf32>
    %16 = vector.shape_cast %15 : vector<1x16x32xf32> to vector<16x32xf32>
    %c1_12 = arith.constant 1 : index
    %c0_13 = arith.constant 0 : index
    %c0_14 = arith.constant 0 : index
    %17 = vector.load %arg3[%c1_12, %c0_13, %c0_14] : memref<8x16x32xf32, #tpu.memory_space<vmem>>, vector<1x16x32xf32>
    %18 = vector.shape_cast %17 : vector<1x16x32xf32> to vector<16x32xf32>
    %cst_15 = arith.constant dense<0xFF800000> : vector<16xf32>
    %19 = vector.multi_reduction <maximumf>, %16, %cst_15 [1] : vector<16x32xf32> to vector<16xf32>
    %20 = vector.shape_cast %19 : vector<16xf32> to vector<16x1xf32>
    %21 = arith.mulf %16, %18 : vector<16x32xf32>
    %cst_16 = arith.constant dense<0.000000e+00> : vector<16xf32>
    %22 = vector.multi_reduction <add>, %21, %cst_16 [1] : vector<16x32xf32> to vector<16xf32>
    %23 = vector.shape_cast %22 : vector<16xf32> to vector<16x1xf32>
    %c2 = arith.constant 2 : index
    %c0_17 = arith.constant 0 : index
    %c0_18 = arith.constant 0 : index
    %24 = vector.load %arg2[%c2, %c0_17, %c0_18] : memref<8x16x32xf32, #tpu.memory_space<vmem>>, vector<1x16x32xf32>
    %25 = vector.shape_cast %24 : vector<1x16x32xf32> to vector<16x32xf32>
    %c2_19 = arith.constant 2 : index
    %c0_20 = arith.constant 0 : index
    %c0_21 = arith.constant 0 : index
    %26 = vector.load %arg3[%c2_19, %c0_20, %c0_21] : memref<8x16x32xf32, #tpu.memory_space<vmem>>, vector<1x16x32xf32>
    %27 = vector.shape_cast %26 : vector<1x16x32xf32> to vector<16x32xf32>
    %cst_22 = arith.constant dense<0xFF800000> : vector<16xf32>
    %28 = vector.multi_reduction <maximumf>, %25, %cst_22 [1] : vector<16x32xf32> to vector<16xf32>
    %29 = vector.shape_cast %28 : vector<16xf32> to vector<16x1xf32>
    %30 = arith.mulf %25, %27 : vector<16x32xf32>
    %cst_23 = arith.constant dense<0.000000e+00> : vector<16xf32>
    %31 = vector.multi_reduction <add>, %30, %cst_23 [1] : vector<16x32xf32> to vector<16xf32>
    %32 = vector.shape_cast %31 : vector<16xf32> to vector<16x1xf32>
    %c3 = arith.constant 3 : index
    %c0_24 = arith.constant 0 : index
    %c0_25 = arith.constant 0 : index
    %33 = vector.load %arg2[%c3, %c0_24, %c0_25] : memref<8x16x32xf32, #tpu.memory_space<vmem>>, vector<1x16x32xf32>
    %34 = vector.shape_cast %33 : vector<1x16x32xf32> to vector<16x32xf32>
    %c3_26 = arith.constant 3 : index
    %c0_27 = arith.constant 0 : index
    %c0_28 = arith.constant 0 : index
    %35 = vector.load %arg3[%c3_26, %c0_27, %c0_28] : memref<8x16x32xf32, #tpu.memory_space<vmem>>, vector<1x16x32xf32>
    %36 = vector.shape_cast %35 : vector<1x16x32xf32> to vector<16x32xf32>
    %cst_29 = arith.constant dense<0xFF800000> : vector<16xf32>
    %37 = vector.multi_reduction <maximumf>, %34, %cst_29 [1] : vector<16x32xf32> to vector<16xf32>
    %38 = vector.shape_cast %37 : vector<16xf32> to vector<16x1xf32>
    %39 = arith.mulf %34, %36 : vector<16x32xf32>
    %cst_30 = arith.constant dense<0.000000e+00> : vector<16xf32>
    %40 = vector.multi_reduction <add>, %39, %cst_30 [1] : vector<16x32xf32> to vector<16xf32>
    %41 = vector.shape_cast %40 : vector<16xf32> to vector<16x1xf32>
    %c4 = arith.constant 4 : index
    %c0_31 = arith.constant 0 : index
    %c0_32 = arith.constant 0 : index
    %42 = vector.load %arg2[%c4, %c0_31, %c0_32] : memref<8x16x32xf32, #tpu.memory_space<vmem>>, vector<1x16x32xf32>
    %43 = vector.shape_cast %42 : vector<1x16x32xf32> to vector<16x32xf32>
    %c4_33 = arith.constant 4 : index
    %c0_34 = arith.constant 0 : index
    %c0_35 = arith.constant 0 : index
    %44 = vector.load %arg3[%c4_33, %c0_34, %c0_35] : memref<8x16x32xf32, #tpu.memory_space<vmem>>, vector<1x16x32xf32>
    %45 = vector.shape_cast %44 : vector<1x16x32xf32> to vector<16x32xf32>
    %cst_36 = arith.constant dense<0xFF800000> : vector<16xf32>
    %46 = vector.multi_reduction <maximumf>, %43, %cst_36 [1] : vector<16x32xf32> to vector<16xf32>
    %47 = vector.shape_cast %46 : vector<16xf32> to vector<16x1xf32>
    %48 = arith.mulf %43, %45 : vector<16x32xf32>
    %cst_37 = arith.constant dense<0.000000e+00> : vector<16xf32>
    %49 = vector.multi_reduction <add>, %48, %cst_37 [1] : vector<16x32xf32> to vector<16xf32>
    %50 = vector.shape_cast %49 : vector<16xf32> to vector<16x1xf32>
    %c5 = arith.constant 5 : index
    %c0_38 = arith.constant 0 : index
    %c0_39 = arith.constant 0 : index
    %51 = vector.load %arg2[%c5, %c0_38, %c0_39] : memref<8x16x32xf32, #tpu.memory_space<vmem>>, vector<1x16x32xf32>
    %52 = vector.shape_cast %51 : vector<1x16x32xf32> to vector<16x32xf32>
    %c5_40 = arith.constant 5 : index
    %c0_41 = arith.constant 0 : index
    %c0_42 = arith.constant 0 : index
    %53 = vector.load %arg3[%c5_40, %c0_41, %c0_42] : memref<8x16x32xf32, #tpu.memory_space<vmem>>, vector<1x16x32xf32>
    %54 = vector.shape_cast %53 : vector<1x16x32xf32> to vector<16x32xf32>
    %cst_43 = arith.constant dense<0xFF800000> : vector<16xf32>
    %55 = vector.multi_reduction <maximumf>, %52, %cst_43 [1] : vector<16x32xf32> to vector<16xf32>
    %56 = vector.shape_cast %55 : vector<16xf32> to vector<16x1xf32>
    %57 = arith.mulf %52, %54 : vector<16x32xf32>
    %cst_44 = arith.constant dense<0.000000e+00> : vector<16xf32>
    %58 = vector.multi_reduction <add>, %57, %cst_44 [1] : vector<16x32xf32> to vector<16xf32>
    %59 = vector.shape_cast %58 : vector<16xf32> to vector<16x1xf32>
    %c6 = arith.constant 6 : index
    %c0_45 = arith.constant 0 : index
    %c0_46 = arith.constant 0 : index
    %60 = vector.load %arg2[%c6, %c0_45, %c0_46] : memref<8x16x32xf32, #tpu.memory_space<vmem>>, vector<1x16x32xf32>
    %61 = vector.shape_cast %60 : vector<1x16x32xf32> to vector<16x32xf32>
    %c6_47 = arith.constant 6 : index
    %c0_48 = arith.constant 0 : index
    %c0_49 = arith.constant 0 : index
    %62 = vector.load %arg3[%c6_47, %c0_48, %c0_49] : memref<8x16x32xf32, #tpu.memory_space<vmem>>, vector<1x16x32xf32>
    %63 = vector.shape_cast %62 : vector<1x16x32xf32> to vector<16x32xf32>
    %cst_50 = arith.constant dense<0xFF800000> : vector<16xf32>
    %64 = vector.multi_reduction <maximumf>, %61, %cst_50 [1] : vector<16x32xf32> to vector<16xf32>
    %65 = vector.shape_cast %64 : vector<16xf32> to vector<16x1xf32>
    %66 = arith.mulf %61, %63 : vector<16x32xf32>
    %cst_51 = arith.constant dense<0.000000e+00> : vector<16xf32>
    %67 = vector.multi_reduction <add>, %66, %cst_51 [1] : vector<16x32xf32> to vector<16xf32>
    %68 = vector.shape_cast %67 : vector<16xf32> to vector<16x1xf32>
    %c7 = arith.constant 7 : index
    %c0_52 = arith.constant 0 : index
    %c0_53 = arith.constant 0 : index
    %69 = vector.load %arg2[%c7, %c0_52, %c0_53] : memref<8x16x32xf32, #tpu.memory_space<vmem>>, vector<1x16x32xf32>
    %70 = vector.shape_cast %69 : vector<1x16x32xf32> to vector<16x32xf32>
    %c7_54 = arith.constant 7 : index
    %c0_55 = arith.constant 0 : index
    %c0_56 = arith.constant 0 : index
    %71 = vector.load %arg3[%c7_54, %c0_55, %c0_56] : memref<8x16x32xf32, #tpu.memory_space<vmem>>, vector<1x16x32xf32>
    %72 = vector.shape_cast %71 : vector<1x16x32xf32> to vector<16x32xf32>
    %cst_57 = arith.constant dense<0xFF800000> : vector<16xf32>
    %73 = vector.multi_reduction <maximumf>, %70, %cst_57 [1] : vector<16x32xf32> to vector<16xf32>
    %74 = vector.shape_cast %73 : vector<16xf32> to vector<16x1xf32>
    %75 = arith.mulf %70, %72 : vector<16x32xf32>
    %cst_58 = arith.constant dense<0.000000e+00> : vector<16xf32>
    %76 = vector.multi_reduction <add>, %75, %cst_58 [1] : vector<16x32xf32> to vector<16xf32>
    %77 = vector.shape_cast %76 : vector<16xf32> to vector<16x1xf32>
    %78 = tpu.concatenate %11, %20, %29, %38, %47, %56, %65, %74 in 1 : vector<16x1xf32>, vector<16x1xf32>, vector<16x1xf32>, vector<16x1xf32>, vector<16x1xf32>, vector<16x1xf32>, vector<16x1xf32>, vector<16x1xf32> -> vector<16x8xf32>
    %79 = tpu.concatenate %14, %23, %32, %41, %50, %59, %68, %77 in 1 : vector<16x1xf32>, vector<16x1xf32>, vector<16x1xf32>, vector<16x1xf32>, vector<16x1xf32>, vector<16x1xf32>, vector<16x1xf32>, vector<16x1xf32> -> vector<16x8xf32>
    %80 = arith.mulf %5, %78 : vector<16x8xf32>
    %81 = arith.mulf %5, %79 : vector<16x8xf32>
    %cst_59 = arith.constant dense<0.000000e+00> : vector<8xf32>
    %82 = vector.multi_reduction <add>, %80, %cst_59 [0] : vector<16x8xf32> to vector<8xf32>
    %83 = vector.shape_cast %82 : vector<8xf32> to vector<1x8xf32>
    %cst_60 = arith.constant dense<0.000000e+00> : vector<16xf32>
    %84 = vector.multi_reduction <add>, %80, %cst_60 [1] : vector<16x8xf32> to vector<16xf32>
    %85 = vector.shape_cast %84 : vector<16xf32> to vector<16x1xf32>
    %86 = vector.broadcast %4 : vector<1x1xf32> to vector<1x8xf32>
    %87 = arith.subf %83, %86 : vector<1x8xf32>
    %88 = arith.mulf %87, %87 : vector<1x8xf32>
    %cst_61 = arith.constant dense<0.000000e+00> : vector<1xf32>
    %89 = vector.multi_reduction <add>, %88, %cst_61 [1] : vector<1x8xf32> to vector<1xf32>
    %90 = vector.shape_cast %89 : vector<1xf32> to vector<1x1xf32>
    %cst_62 = arith.constant dense<0.000000e+00> : vector<1xf32>
    %91 = vector.multi_reduction <add>, %90, %cst_62 [0] : vector<1x1xf32> to vector<1xf32>
    %92 = vector.shape_cast %91 : vector<1xf32> to vector<1x1xf32>
    %cst_63 = arith.constant 1.250000e-01 : f32
    %93 = vector.broadcast %cst_63 : f32 to vector<1x1xf32>
    %94 = arith.mulf %92, %93 : vector<1x1xf32>
    %95 = vector.broadcast %3 : vector<1x1xf32> to vector<16x1xf32>
    %96 = arith.subf %85, %95 : vector<16x1xf32>
    %97 = arith.mulf %96, %96 : vector<16x1xf32>
    %cst_64 = arith.constant dense<0.000000e+00> : vector<16xf32>
    %98 = vector.multi_reduction <add>, %97, %cst_64 [1] : vector<16x1xf32> to vector<16xf32>
    %99 = vector.shape_cast %98 : vector<16xf32> to vector<16x1xf32>
    %cst_65 = arith.constant dense<0.000000e+00> : vector<1xf32>
    %100 = vector.multi_reduction <add>, %99, %cst_65 [0] : vector<16x1xf32> to vector<1xf32>
    %101 = vector.shape_cast %100 : vector<1xf32> to vector<1x1xf32>
    %cst_66 = arith.constant 6.250000e-02 : f32
    %102 = vector.broadcast %cst_66 : f32 to vector<1x1xf32>
    %103 = arith.mulf %101, %102 : vector<1x1xf32>
    %cst_67 = arith.constant dense<0xFF800000> : vector<16xf32>
    %104 = vector.multi_reduction <maximumf>, %81, %cst_67 [1] : vector<16x8xf32> to vector<16xf32>
    %105 = vector.shape_cast %104 : vector<16xf32> to vector<16x1xf32>
    %106 = vector.broadcast %105 : vector<16x1xf32> to vector<16x8xf32>
    %107 = arith.subf %81, %106 : vector<16x8xf32>
    %108 = math.exp %107 : vector<16x8xf32>
    %cst_68 = arith.constant dense<0.000000e+00> : vector<16xf32>
    %109 = vector.multi_reduction <add>, %108, %cst_68 [1] : vector<16x8xf32> to vector<16xf32>
    %110 = vector.shape_cast %109 : vector<16xf32> to vector<16x1xf32>
    %111 = math.log %110 : vector<16x1xf32>
    %112 = arith.addf %105, %111 : vector<16x1xf32>
    %113 = arith.mulf %108, %81 : vector<16x8xf32>
    %cst_69 = arith.constant dense<0.000000e+00> : vector<16xf32>
    %114 = vector.multi_reduction <add>, %113, %cst_69 [1] : vector<16x8xf32> to vector<16xf32>
    %115 = vector.shape_cast %114 : vector<16xf32> to vector<16x1xf32>
    %116 = arith.divf %115, %110 : vector<16x1xf32>
    %117 = arith.subf %112, %116 : vector<16x1xf32>
    %cst_70 = arith.constant dense<0.000000e+00> : vector<16xf32>
    %118 = vector.multi_reduction <add>, %117, %cst_70 [1] : vector<16x1xf32> to vector<16xf32>
    %119 = vector.shape_cast %118 : vector<16xf32> to vector<16x1xf32>
    %cst_71 = arith.constant dense<0.000000e+00> : vector<1xf32>
    %120 = vector.multi_reduction <add>, %119, %cst_71 [0] : vector<16x1xf32> to vector<1xf32>
    %121 = vector.shape_cast %120 : vector<1xf32> to vector<1x1xf32>
    %cst_72 = arith.constant 6.250000e-02 : f32
    %122 = vector.broadcast %cst_72 : f32 to vector<1x1xf32>
    %123 = arith.mulf %121, %122 : vector<1x1xf32>
    %cst_73 = arith.constant dense<0xFF800000> : vector<8xf32>
    %124 = vector.multi_reduction <maximumf>, %81, %cst_73 [0] : vector<16x8xf32> to vector<8xf32>
    %125 = vector.shape_cast %124 : vector<8xf32> to vector<1x8xf32>
    %126 = vector.broadcast %125 : vector<1x8xf32> to vector<16x8xf32>
    %127 = arith.subf %81, %126 : vector<16x8xf32>
    %128 = math.exp %127 : vector<16x8xf32>
    %cst_74 = arith.constant dense<0.000000e+00> : vector<8xf32>
    %129 = vector.multi_reduction <add>, %128, %cst_74 [0] : vector<16x8xf32> to vector<8xf32>
    %130 = vector.shape_cast %129 : vector<8xf32> to vector<1x8xf32>
    %131 = math.log %130 : vector<1x8xf32>
    %132 = arith.addf %125, %131 : vector<1x8xf32>
    %133 = arith.mulf %128, %81 : vector<16x8xf32>
    %cst_75 = arith.constant dense<0.000000e+00> : vector<8xf32>
    %134 = vector.multi_reduction <add>, %133, %cst_75 [0] : vector<16x8xf32> to vector<8xf32>
    %135 = vector.shape_cast %134 : vector<8xf32> to vector<1x8xf32>
    %136 = arith.divf %135, %130 : vector<1x8xf32>
    %137 = arith.subf %132, %136 : vector<1x8xf32>
    %cst_76 = arith.constant dense<0.000000e+00> : vector<1xf32>
    %138 = vector.multi_reduction <add>, %137, %cst_76 [1] : vector<1x8xf32> to vector<1xf32>
    %139 = vector.shape_cast %138 : vector<1xf32> to vector<1x1xf32>
    %cst_77 = arith.constant dense<0.000000e+00> : vector<1xf32>
    %140 = vector.multi_reduction <add>, %139, %cst_77 [0] : vector<1x1xf32> to vector<1xf32>
    %141 = vector.shape_cast %140 : vector<1xf32> to vector<1x1xf32>
    %cst_78 = arith.constant 1.250000e-01 : f32
    %142 = vector.broadcast %cst_78 : f32 to vector<1x1xf32>
    %143 = arith.mulf %141, %142 : vector<1x1xf32>
    %cst_79 = arith.constant 0.000000e+00 : f32
    %144 = vector.broadcast %cst_79 : f32 to vector<1x1xf32>
    %145 = arith.subf %144, %1 : vector<1x1xf32>
    %146 = arith.subf %145, %2 : vector<1x1xf32>
    %147 = arith.addf %94, %103 : vector<1x1xf32>
    %148 = arith.addf %146, %147 : vector<1x1xf32>
    %149 = arith.subf %123, %143 : vector<1x1xf32>
    %cst_80 = arith.constant 1.000000e+01 : f32
    %150 = vector.broadcast %cst_80 : f32 to vector<1x1xf32>
    %151 = arith.mulf %150, %149 : vector<1x1xf32>
    %152 = arith.addf %148, %151 : vector<1x1xf32>
    %c0_81 = arith.constant 0 : index
    %c0_82 = arith.constant 0 : index
    %153 = vector.load %arg5[%c0_81, %c0_82] : memref<1x1xf32, #tpu.memory_space<vmem>>, vector<1x1xf32>
    tpu.vector_store %arg5[%c0_81, %c0_82], %152 {strides = array<i32>} : memref<1x1xf32, #tpu.memory_space<vmem>>, vector<1x1xf32>,
    return
  }
  func.func @transform_0(%arg0: i32) -> (i32, i32) {
    %c0_i32 = arith.constant 0 : i32
    %c0_i32_0 = arith.constant 0 : i32
    %c0_i32_1 = arith.constant 0 : i32
    return %c0_i32, %c0_i32_0 : i32, i32
  }
  func.func @transform_1(%arg0: i32) -> (i32, i32, i32) {
    %c0_i32 = arith.constant 0 : i32
    %c0_i32_0 = arith.constant 0 : i32
    %c0_i32_1 = arith.constant 0 : i32
    %c0_i32_2 = arith.constant 0 : i32
    return %c0_i32, %c0_i32_0, %c0_i32_1 : i32, i32, i32
  }
  func.func @transform_2(%arg0: i32) -> (i32, i32, i32) {
    %c0_i32 = arith.constant 0 : i32
    %c0_i32_0 = arith.constant 0 : i32
    %c0_i32_1 = arith.constant 0 : i32
    %c0_i32_2 = arith.constant 0 : i32
    return %c0_i32, %c0_i32_0, %c0_i32_1 : i32, i32, i32
  }
  func.func @transform_3(%arg0: i32) -> (i32, i32) {
    %c0_i32 = arith.constant 0 : i32
    %c0_i32_0 = arith.constant 0 : i32
    %c0_i32_1 = arith.constant 0 : i32
    return %c0_i32, %c0_i32_0 : i32, i32
  }
  func.func @transform_4(%arg0: i32) -> (i32, i32) {
    %c0_i32 = arith.constant 0 : i32
    %c0_i32_0 = arith.constant 0 : i32
    %c0_i32_1 = arith.constant 0 : i32
    return %c0_i32, %c0_i32_0 : i32, i32
  }
}

</mosaic_0001>

<bundles_post_ra>
// kernel: tpu_custom_call.1
= control target key start
LH: loop header
LB: loop body
LE: loop exit
PB: predicated region body
PF: predicated region fallthrough
CT: control target
= control target key end

     0   :  { %9 = vsyncpa [#allocation3], 0  ;;  %s775_s0 = inlined_call_operand.vmem [shape: f32[1,4], index: 0, kind: input, shape index: {}]   ;;  %s776_s1 = inlined_call_operand.hbm [shape: f32[8,16,32], index: 1, kind: input, shape index: {}]   ;;  %s777_s2 = inlined_call_operand.hbm [shape: f32[8,16,32], index: 2, kind: input, shape index: {}]   ;;  %s778_s3 = inlined_call_operand.vmem [shape: f32[16,8], index: 3, kind: input, shape index: {}]   ;;  %s779_s4 = inlined_call_operand.hbm [shape: f32[1,1], index: 4, kind: output, shape index: {}]  }
   0x1   :  { %10 = vsyncpa [#allocation6], 0 }
   0x2   :  { %11 = vsyncpa [#allocation4], 0  ;;  %s18_s17 = sshll.u32 %s776_s1, 4  ;;  %s571_s18 = smov [#allocation2]   ;;  %s19_s17 = int_to_ptr.hbm [resolvable:$true] %s18_s17 }
   0x3   :  { %s20_s19 = sshll.u32 %s571_s18, 4  ;;  %s31_s22 = sshll.u32 %s777_s2, 4  ;;  %s21_s19 = int_to_ptr.vmem [resolvable:$true] %s20_s19  ;;  %s32_s22 = int_to_ptr.hbm [resolvable:$true] %s31_s22 }
   0x4   :  { %s572_s23 = smov 128   ;;  %s573_s24 = smov 8  }
   0x5   :  { %26 = dma.hbm_to_vmem [thread:$0]  %s19_s17, 2048, %s21_s19, [#allocation3], %s572_s23, %s572_s23, %s573_s24  }
   0x6   :  { %s574_s25 = smov [#allocation5]  }
   0x7   :  { %s33_s26 = sshll.u32 %s574_s25, 4  ;;  %s34_s26 = int_to_ptr.vmem [resolvable:$true] %s33_s26 }
   0x8   :  { %39 = dma.hbm_to_vmem [thread:$0]  %s32_s22, 2048, %s34_s26, [#allocation6], %s572_s23, %s572_s23, %s573_s24  }
   0x9   :  { %565 = dma.done.wait [#allocation3], 2048  }
   0xa   :  { %566 = vsyncadd [#allocation3], 4294965248 }
   0xb   :  { %567 = dma.done.wait [#allocation6], 2048  }
   0xc   :  { %568 = vsyncadd [#allocation6], 4294965248  ;;  %vm57_vm0 = vcmask 261120   ;;  %v610_v0 = vld [vmem:[#allocation2 + $0x10] sm:$0xff]  ;;  %v612_v2 = vld [vmem:[#allocation2] sm:$0xff]  ;;  %vm212_vm1 = vcmask 7168  }
   0xd   :  { %v76_v1 = vld [vmem:[#allocation5 + $0x10] sm:$0xff]  ;;  %v55_v4 = vld [vmem:[#allocation5] sm:$0xff]  ;;  %v619_v9 = vld [vmem:[#allocation2 + $0x18] sm:$0xff]  ;;  %v58_v63 = vsel %vm57_vm0, %v612_v2, -inf  ;;  %vm215_vm2 = vcmask 15360   ;;  %vm218_vm3 = vcmask 23552  }
   0xe   :  { %v84_v3 = vmul.f32 %v76_v1, %v610_v0  ;;  %v615_v5 = vld [vmem:[#allocation2 + $0x20] sm:$0xff]  ;;  %v64_v7 = vmul.f32 %v55_v4, %v612_v2  ;;  %v77_v10 = vld [vmem:[#allocation5 + $0x18] sm:$0xff]  ;;  %v621_v11 = vld [vmem:[#allocation2 + $0x8] sm:$0xff]  ;;  %v81_v4 = vsel %vm57_vm0, %v619_v9, -inf  ;;  %v575_v2 = vmov 3   ;;  %s578_s7 = smov [#allocation7]  }
   0xf   :  { %v96_v6 = vld [vmem:[#allocation5 + $0x20] sm:$0xff]  ;;  %v56_v13 = vld [vmem:[#allocation5 + $0x8] sm:$0xff]  ;;  %v85_v18 = vmul.f32 %v77_v10, %v619_v9  ;;  %v634_v24 = vld [vmem:[#allocation2 + $0x38] sm:$0xff]  ;;  %470 = vset.pattern.permute.xlu1 %v575_v2  ;;  %471 = vset.pattern.permute.xlu0 %v575_v2  ;;  %vm221_vm4 = vcmask 31744   ;;  %vm224_vm5 = vcmask 39936   ;;  %vm227_vm6 = vcmask 48128  }
  0x10   :  { %v104_v8 = vmul.f32 %v96_v6, %v615_v5  ;;  %v86_v12 = vsel %vm57_vm0, %v84_v3, 0.0  ;;  %v624_v14 = vld [vmem:[#allocation2 + $0x28] sm:$0xff]  ;;  %v66_v16 = vsel %vm57_vm0, %v64_v7, 0.0  ;;  %v65_v19 = vmul.f32 %v56_v13, %v621_v11  ;;  %v117_v25 = vld [vmem:[#allocation5 + $0x38] sm:$0xff]  ;;  %v636_v26 = vld [vmem:[#allocation2 + $0x30] sm:$0xff]  ;;  %s449_s8 = sshll.u32 %s578_s7, 4  ;;  %s450_s8 = int_to_ptr.vmem [resolvable:$true] %s449_s8 }
  0x11   :  { %v97_v15 = vld [vmem:[#allocation5 + $0x28] sm:$0xff]  ;;  %87 = vadd.xlane.f32.xlu1 %v86_v12  ;;  %67 = vadd.xlane.f32.xlu0 %v66_v16  ;;  %v89_v21 = vsel %vm57_vm0, %v85_v18, 0.0  ;;  %v116_v27 = vld [vmem:[#allocation5 + $0x30] sm:$0xff]  ;;  %v638_v28 = vld [vmem:[#allocation2 + $0x40] sm:$0xff]  ;;  %v125_v30 = vmul.f32 %v117_v25, %v634_v24  ;;  %v61_v3 = vsel %vm57_vm0, %v621_v11, -inf  ;;  %v78_v6 = vsel %vm57_vm0, %v610_v0, -inf }
  0x12   :  { %v106_v17 = vsel %vm57_vm0, %v104_v8, 0.0  ;;  %v105_v20 = vmul.f32 %v97_v15, %v624_v14  ;;  %v69_v22 = vsel %vm57_vm0, %v65_v19, 0.0  ;;  %v136_v29 = vld [vmem:[#allocation5 + $0x40] sm:$0xff]  ;;  %v124_v31 = vmul.f32 %v116_v27, %v636_v26  ;;  %v153_v36 = vld [vmem:[#allocation2 + $0x50] sm:$0xff]  ;;  %v134_v38 = vld [vmem:[#allocation2 + $0x48] sm:$0xff]  ;;  %s451_s11 = sshll.u32 %s779_s4, 4  ;;  %s452_s11 = int_to_ptr.hbm [resolvable:$true] %s451_s11 }
  0x13   :  { %107 = vadd.xlane.f32.xlu2 %v106_v17  ;;  %v144_v32 = vmul.f32 %v136_v29, %v638_v28  ;;  %v129_v33 = vsel %vm57_vm0, %v125_v30, 0.0  ;;  %v156_v37 = vld [vmem:[#allocation5 + $0x50] sm:$0xff]  ;;  %v137_v39 = vld [vmem:[#allocation5 + $0x48] sm:$0xff]  ;;  %v154_v40 = vld [vmem:[#allocation2 + $0x58] sm:$0xff]  ;;  %v98_v7 = vsel %vm57_vm0, %v615_v5, -inf  ;;  %v118_v8 = vsel %vm57_vm0, %v636_v26, -inf }
  0x14   :  { %v109_v23 = vsel %vm57_vm0, %v105_v20, 0.0  ;;  %v126_v34 = vsel %vm57_vm0, %v124_v31, 0.0  ;;  %v157_v41 = vld [vmem:[#allocation5 + $0x58] sm:$0xff]  ;;  %v164_v42 = vmul.f32 %v156_v37, %v153_v36  ;;  %v145_v43 = vmul.f32 %v137_v39, %v134_v38  ;;  %v174_v48 = vld [vmem:[#allocation2 + $0x68] sm:$0xff]  ;;  %v173_v50 = vld [vmem:[#allocation2 + $0x60] sm:$0xff] }
  0x15   :  { %v146_v35 = vsel %vm57_vm0, %v144_v32, 0.0  ;;  %v165_v44 = vmul.f32 %v157_v41, %v154_v40  ;;  %v177_v49 = vld [vmem:[#allocation5 + $0x68] sm:$0xff]  ;;  %v176_v51 = vld [vmem:[#allocation5 + $0x60] sm:$0xff]  ;;  %v193_v52 = vld [vmem:[#allocation2 + $0x70] sm:$0xff]  ;;  %v101_v10 = vsel %vm57_vm0, %v624_v14, -inf  ;;  %v121_v9 = vsel %vm57_vm0, %v634_v24, -inf }
  0x16   :  { %v166_v45 = vsel %vm57_vm0, %v164_v42, 0.0  ;;  %v149_v46 = vsel %vm57_vm0, %v145_v43, 0.0  ;;  %v196_v53 = vld [vmem:[#allocation5 + $0x70] sm:$0xff]  ;;  %v185_v54 = vmul.f32 %v177_v49, %v174_v48  ;;  %v184_v55 = vmul.f32 %v176_v51, %v173_v50  ;;  %v194_v60 = vld [vmem:[#allocation2 + $0x78] sm:$0xff]  ;;  %v681_v17 = vld [vmem:[%s775_s0] sm:$0x1] }
  0x17   :  { %v169_v47 = vsel %vm57_vm0, %v165_v44, 0.0  ;;  %v204_v56 = vmul.f32 %v196_v53, %v193_v52  ;;  %v197_v61 = vld [vmem:[#allocation5 + $0x78] sm:$0xff]  ;;  %v141_v0 = vsel %vm57_vm0, %v134_v38, -inf  ;;  %v138_v5 = vsel %vm57_vm0, %v638_v28, -inf  ;;  %v693_v39 = vld [vmem:[%s778_s3] sm:$0xff] }
  0x18   :  { %v189_v57 = vsel %vm57_vm0, %v185_v54, 0.0  ;;  %v186_v58 = vsel %vm57_vm0, %v184_v55, 0.0  ;;  %v205_v62 = vmul.f32 %v197_v61, %v194_v60  ;;  %v158_v11 = vsel %vm57_vm0, %v153_v36, -inf }
  0x19   :  { %90 = vadd.xlane.f32.xlu1 %v89_v21  ;;  %70 = vadd.xlane.f32.xlu0 %v69_v22  ;;  %v206_v59 = vsel %vm57_vm0, %v204_v56, 0.0  ;;  %v178_v12 = vsel %vm57_vm0, %v173_v50, -inf  ;;  %v161_v13 = vsel %vm57_vm0, %v154_v40, -inf  ;;  %v181_v14 = vsel %vm57_vm0, %v174_v48, -inf  ;;  %v709_v48 = vld [vmem:[%s778_s3 + $0x8] sm:$0xff]  ;;  %s576_s3 = smov 127  }
  0x1a   :  { %v209_v1 = vsel %vm57_vm0, %v205_v62, 0.0  ;;  %v201_v15 = vsel %vm57_vm0, %v194_v60, -inf  ;;  %v198_v16 = vsel %vm57_vm0, %v193_v52, -inf  ;;  %vm230_vm7 = vcmask 56320  }
  0x1b   :  { %110 = vadd.xlane.f32.xlu2 %v109_v23  ;;  %vm251_vm8 = vcmask 64512   ;;  %vm286_vm13 = vcmask 23568  }
  0x21   :  { %130 = vadd.xlane.f32.xlu1 %v129_v33  ;;  %127 = vadd.xlane.f32.xlu0 %v126_v34 }
  0x23   :  { %147 = vadd.xlane.f32.xlu2 %v146_v35 }
  0x29   :  { %167 = vadd.xlane.f32.xlu1 %v166_v45  ;;  %150 = vadd.xlane.f32.xlu0 %v149_v46 }
  0x2b   :  { %170 = vadd.xlane.f32.xlu2 %v169_v47 }
  0x31   :  { %190 = vadd.xlane.f32.xlu1 %v189_v57  ;;  %187 = vadd.xlane.f32.xlu0 %v186_v58 }
  0x33   :  { %207 = vadd.xlane.f32.xlu2 %v206_v59 }
  0x39   :  { %59 = vmax.xlane.f32.xlu1 %v58_v63  ;;  %210 = vadd.xlane.f32.xlu0 %v209_v1 }
  0x3b   :  { %62 = vmax.xlane.f32.xlu2 %v61_v3 }
  0x41   :  { %82 = vmax.xlane.f32.xlu1 %v81_v4  ;;  %79 = vmax.xlane.f32.xlu0 %v78_v6 }
  0x43   :  { %99 = vmax.xlane.f32.xlu2 %v98_v7 }
  0x49   :  { %119 = vmax.xlane.f32.xlu1 %v118_v8  ;;  %102 = vmax.xlane.f32.xlu0 %v101_v10 }
  0x4b   :  { %122 = vmax.xlane.f32.xlu2 %v121_v9 }
  0x51   :  { %142 = vmax.xlane.f32.xlu1 %v141_v0  ;;  %139 = vmax.xlane.f32.xlu0 %v138_v5 }
  0x53   :  { %159 = vmax.xlane.f32.xlu2 %v158_v11 }
  0x59   :  { %179 = vmax.xlane.f32.xlu1 %v178_v12  ;;  %162 = vmax.xlane.f32.xlu0 %v161_v13 }
  0x5b   :  { %182 = vmax.xlane.f32.xlu2 %v181_v14 }
  0x61   :  { %202 = vmax.xlane.f32.xlu1 %v201_v15  ;;  %199 = vmax.xlane.f32.xlu0 %v198_v16 }
  0x7a   :  { %267 = vperm.xlu1 %470, %v681_v17  }
  0x84   :  { %v88_v18 = vpop.xlane.xlu1 %87  ;;  %v68_v19 = vpop.xlane.xlu0 %67 }
  0x85   :  { %v233_v28 = vsel %vm212_vm1, %v68_v19, %v88_v18 }
  0x86   :  { %v108_v20 = vpop.xlane.xlu2 %107 }
  0x87   :  { %v235_v31 = vsel %vm215_vm2, %v233_v28, %v108_v20 }
  0x8c   :  { %v91_v21 = vpop.xlane.xlu1 %90  ;;  %v71_v22 = vpop.xlane.xlu0 %70 }
  0x8d   :  { %v234_v33 = vsel %vm212_vm1, %v71_v22, %v91_v21 }
  0x8e   :  { %v111_v23 = vpop.xlane.xlu2 %110 }
  0x8f   :  { %v236_v41 = vsel %vm215_vm2, %v234_v33, %v111_v23 }
  0x94   :  { %v131_v24 = vpop.xlane.xlu1 %130  ;;  %v128_v25 = vpop.xlane.xlu0 %127 }
  0x95   :  { %v237_v32 = vsel %vm218_vm3, %v235_v31, %v128_v25  ;;  %v238_v43 = vsel %vm218_vm3, %v236_v41, %v131_v24 }
  0x96   :  { %v148_v26 = vpop.xlane.xlu2 %147 }
  0x97   :  { %v239_v34 = vsel %vm221_vm4, %v237_v32, %v148_v26 }
  0x9c   :  { %v168_v27 = vpop.xlane.xlu1 %167  ;;  %v151_v29 = vpop.xlane.xlu0 %150 }
  0x9d   :  { %v241_v36 = vsel %vm224_vm5, %v239_v34, %v168_v27  ;;  %v240_v45 = vsel %vm221_vm4, %v238_v43, %v151_v29 }
  0x9e   :  { %v171_v30 = vpop.xlane.xlu2 %170 }
  0x9f   :  { %v242_v47 = vsel %vm224_vm5, %v240_v45, %v171_v30 }
  0xa4   :  { %v191_v35 = vpop.xlane.xlu1 %190  ;;  %v188_v37 = vpop.xlane.xlu0 %187 }
  0xa5   :  { %v243_v40 = vsel %vm227_vm6, %v241_v36, %v188_v37  ;;  %v244_v50 = vsel %vm227_vm6, %v242_v47, %v191_v35 }
  0xa6   :  { %v208_v38 = vpop.xlane.xlu2 %207 }
  0xa7   :  { %v245_v42 = vsel %vm230_vm7, %v243_v40, %v208_v38 }
  0xa8   :  { %v700_v44 = vmul.f32 %v245_v42, %v693_v39 }
  0xaa   :  { %v297_v46 = vsel %vm251_vm8, %v700_v44, -inf }
  0xab   :  { %298 = vmax.xlane.f32.xlu2 %v297_v46 }
  0xac   :  { %v60_v49 = vpop.xlane.xlu1 %59  ;;  %v211_v51 = vpop.xlane.xlu0 %210 }
  0xad   :  { %v246_v53 = vsel %vm230_vm7, %v244_v50, %v211_v51 }
  0xae   :  { %v63_v52 = vpop.xlane.xlu2 %62  ;;  %v714_v54 = vmul.f32 %v246_v53, %v709_v48 }
  0xb0   :  { %v300_v55 = vsel %vm251_vm8, %v714_v54, -inf }
  0xb1   :  { %301 = vmax.xlane.f32.xlu0 %v300_v55  ;;  %v371_v56 = vmax.f32 %v297_v46, %v300_v55 }
  0xb3   :  { %v372_v57 = vrot.slane %v371_v56, 4 }
  0xb4   :  { %v83_v58 = vpop.xlane.xlu1 %82  ;;  %v80_v59 = vpop.xlane.xlu0 %79 }
  0xb5   :  { %v373_v61 = vmax.f32 %v371_v56, %v372_v57  ;;  %v213_v15 = vsel %vm212_vm1, %v60_v49, %v80_v59  ;;  %v214_v16 = vsel %vm212_vm1, %v63_v52, %v83_v58 }
  0xb6   :  { %v100_v60 = vpop.xlane.xlu2 %99 }
  0xb7   :  { %v374_v62 = vrot.slane %v373_v61, 2  ;;  %v216_v26 = vsel %vm215_vm2, %v213_v15, %v100_v60 }
  0xb9   :  { %v375_v63 = vmax.f32 %v373_v61, %v374_v62 }
  0xbb   :  { %v376_v1 = vrot.slane %v375_v63, 1 }
  0xbc   :  { %v120_v3 = vpop.xlane.xlu1 %119  ;;  %v103_v4 = vpop.xlane.xlu0 %102 }
  0xbd   :  { %v718_v7 = vmax.f32 %v375_v63, %v376_v1  ;;  %v217_v19 = vsel %vm215_vm2, %v214_v16, %v103_v4  ;;  %v219_v28 = vsel %vm218_vm3, %v216_v26, %v120_v3 }
  0xbe   :  { %v123_v6 = vpop.xlane.xlu2 %122 }
  0xbf   :  { %v378_v2 = vsub.f32 %v700_v44, %v718_v7  ;;  %v379_v8 = vsub.f32 %v714_v54, %v718_v7  ;;  %v220_v27 = vsel %vm218_vm3, %v217_v19, %v123_v6 }
  0xc1   :  { %v380_v10 = vmul.f32 1.442695, %v378_v2  ;;  %v382_v9 = vmul.f32 1.442695, %v379_v8 }
  0xc3   :  { %473 = vpow2.f32 %v380_v10 }
  0xc4   :  { %v143_v0 = vpop.xlane.xlu1 %142  ;;  %475 = vpow2.f32 %v382_v9  ;;  %v140_v5 = vpop.xlane.xlu0 %139 }
  0xc5   :  { %v223_v29 = vsel %vm221_vm4, %v220_v27, %v143_v0  ;;  %v222_v33 = vsel %vm221_vm4, %v219_v28, %v140_v5 }
  0xc6   :  { %v160_v11 = vpop.xlane.xlu2 %159 }
  0xc7   :  { %v225_v38 = vsel %vm224_vm5, %v222_v33, %v160_v11 }
  0xc9   :  { %v474_v12 = vpop.eup %473 }
  0xca   :  { %v476_v13 = vpop.eup %475  ;;  %v384_v14 = vsel %vm251_vm8, %v474_v12, 0.0  ;;  %v396_v21 = vmul.f32 %v474_v12, %v700_v44 }
  0xcb   :  { %v385_v18 = vsel %vm251_vm8, %v476_v13, 0.0  ;;  %v397_v22 = vmul.f32 %v476_v13, %v714_v54 }
  0xcc   :  { %v180_v20 = vpop.xlane.xlu1 %179  ;;  %v386_v23 = vadd.f32 %v385_v18, %v384_v14  ;;  %v163_v24 = vpop.xlane.xlu0 %162  ;;  %v398_v30 = vsel %vm251_vm8, %v396_v21, 0.0 }
  0xcd   :  { %v399_v31 = vsel %vm251_vm8, %v397_v22, 0.0  ;;  %v226_v34 = vsel %vm224_vm5, %v223_v29, %v163_v24  ;;  %v228_v43 = vsel %vm227_vm6, %v225_v38, %v180_v20 }
  0xce   :  { %v387_v25 = vrot.slane %v386_v23, 4  ;;  %v183_v35 = vpop.xlane.xlu2 %182  ;;  %v400_v37 = vadd.f32 %v399_v31, %v398_v30 }
  0xcf   :  { %v229_v40 = vsel %vm227_vm6, %v226_v34, %v183_v35  ;;  %vm442_vm6 = vcmask 0  }
  0xd0   :  { %v388_v32 = vadd.f32 %v387_v25, %v386_v23  ;;  %v401_v52 = vrot.slane %v400_v37, 4 }
  0xd2   :  { %v389_v36 = vrot.slane %v388_v32, 2  ;;  %v402_v58 = vadd.f32 %v401_v52, %v400_v37 }
  0xd4   :  { %v203_v41 = vpop.xlane.xlu1 %202  ;;  %v390_v42 = vadd.f32 %v389_v36, %v388_v32  ;;  %v200_v45 = vpop.xlane.xlu0 %199  ;;  %v403_v61 = vrot.slane %v402_v58, 2 }
  0xd5   :  { %v232_v46 = vsel %vm230_vm7, %v229_v40, %v203_v41  ;;  %v231_v47 = vsel %vm230_vm7, %v228_v43, %v200_v45  ;;  %v472_v40 = vld [vmem:[%s775_s0] ss:$0 sm:$0xff]  ;;  %s577_s0 = smov 126  }
  0xd6   :  { %v248_v49 = vmul.f32 %v232_v46, %v709_v48  ;;  %v391_v50 = vrot.slane %v390_v42, 1  ;;  %v247_v51 = vmul.f32 %v231_v47, %v693_v39  ;;  %v404_v63 = vadd.f32 %v403_v61, %v402_v58 }
  0xd8   :  { %v253_v53 = vsel %vm251_vm8, %v248_v49, 0.0  ;;  %v252_v55 = vsel %vm251_vm8, %v247_v51, 0.0  ;;  %v392_v56 = vadd.f32 %v391_v50, %v390_v42  ;;  %v405_v2 = vrot.slane %v404_v63, 1 }
  0xd9   :  { %263 = vadd.xlane.f32.xlu0 %v253_v53  ;;  %261 = vadd.xlane.f32.xlu2 %v252_v55  ;;  %v254_v57 = vadd.f32 %v253_v53, %v252_v55 }
  0xda   :  { %477 = vrcp.f32 %v392_v56  ;;  %v418_v6 = vand.u32 2147483648, %v392_v56  ;;  %v416_v10 = vand.u32 2147483647, %v392_v56  ;;  %vm412_vm10 = vweird.f32 %v392_v56 }
  0xdb   :  { %v255_v59 = vrot.slane %v254_v57, 4  ;;  %479 = vlog2.f32 %v392_v56  ;;  %v406_v12 = vadd.f32 %v405_v2, %v404_v63 }
  0xdc   :  { %v419_v11 = vor.u32 1.1754944e-38, %v418_v6  ;;  %vm417_vm12 = vcmp.eq.f32.partialorder %v416_v10, 8.507059e+37 }
  0xdd   :  { %v256_v60 = vadd.f32 %v255_v59, %v254_v57 }
  0xdf   :  { %v257_v62 = vrot.slane %v256_v60, 2 }
  0xe0   :  { %v478_v48 = vpop.eup %477 }
  0xe1   :  { %v408_v1 = vmul.f32 %v478_v48, %v392_v56  ;;  %v258_v39 = vadd.f32 %v257_v62, %v256_v60  ;;  %v480_v4 = vpop.eup %479  ;;  %vm413_vm9 = vweird.f32 %v478_v48 }
  0xe2   :  { %v394_v0 = vmul.f32 0.6931472, %v480_v4  ;;  %vm414_vm11 = vmor %vm412_vm10, %vm413_vm9 }
  0xe3   :  { %v409_v3 = vsub.f32 1.0, %v408_v1  ;;  %v259_v9 = vrot.slane %v258_v39, 1 }
  0xe4   :  { %v395_v19 = vadd.f32 %v394_v0, %v718_v7 }
  0xe5   :  { %v410_v8 = vmul.f32 %v478_v48, %v409_v3  ;;  %v260_v16 = vadd.f32 %v259_v9, %v258_v39 }
  0xe7   :  { %v411_v5 = vadd.f32 %v478_v48, %v410_v8 }
  0xe9   :  { %v415_v13 = vsel %vm414_vm11, %v478_v48, %v411_v5 }
  0xea   :  { %v420_v15 = vsel %vm417_vm12, %v419_v11, %v415_v13 }
  0xeb   :  { %v421_v20 = vmul.f32 %v420_v15, %v406_v12 }
  0xec   :  { %v268_v14 = vpop.permute.xlu1 %267 }
  0xed   :  { %v270_v18 = vperm.slane %v268_v14, 0  ;;  %v422_v22 = vsub.f32 %v395_v19, %v421_v20 }
  0xef   :  { %v271_v21 = vsub.f32 %v260_v16, %v270_v18  ;;  %v423_v23 = vsel %vm251_vm8, %v422_v22, 0.0 }
  0xf0   :  { %424 = vadd.xlane.f32.xlu1 %v423_v23 }
  0xf1   :  { %v272_v24 = vmul.f32 %v271_v21, %v271_v21 }
  0xf3   :  { %v273_v25 = vsel %vm251_vm8, %v272_v24, 0.0 }
  0xf4   :  { %274 = vadd.xlane.f32.xlu2 %v273_v25 }
 0x11e   :  { %v751_v26 = vpop.xlane.xlu2 %298 }
 0x11f   :  { %v303_v27 = vsub.f32 %v700_v44, %v751_v26 }
 0x121   :  { %v305_v28 = vmul.f32 1.442695, %v303_v27 }
 0x123   :  { %481 = vpow2.f32 %v305_v28 }
 0x124   :  { %v755_v29 = vpop.xlane.xlu0 %301 }
 0x125   :  { %v304_v7 = vsub.f32 %v714_v54, %v755_v29 }
 0x127   :  { %v307_v30 = vmul.f32 1.442695, %v304_v7 }
 0x129   :  { %v482_v31 = vpop.eup %481  ;;  %483 = vpow2.f32 %v307_v30 }
 0x12a   :  { %v309_v32 = vsel %vm251_vm8, %v482_v31, 0.0  ;;  %v321_v33 = vmul.f32 %v482_v31, %v700_v44 }
 0x12b   :  { %310 = vadd.xlane.f32.xlu0 %v309_v32 }
 0x12c   :  { %v323_v36 = vsel %vm251_vm8, %v321_v33, 0.0 }
 0x12f   :  { %v484_v34 = vpop.eup %483 }
 0x130   :  { %v312_v35 = vsel %vm251_vm8, %v484_v34, 0.0  ;;  %v322_v37 = vmul.f32 %v484_v34, %v714_v54 }
 0x131   :  { %313 = vadd.xlane.f32.xlu2 %v312_v35 }
 0x132   :  { %v326_v38 = vsel %vm251_vm8, %v322_v37, 0.0  ;;  %v428_v37 = vsub.f32 0.0, %v681_v17 }
 0x133   :  { %324 = vadd.xlane.f32.xlu0 %v323_v36 }
 0x139   :  { %327 = vadd.xlane.f32.xlu2 %v326_v38 }
 0x147   :  { %429 = vrot.lane.b32.xlu0 %v681_v17, %s576_s3 }
 0x14c   :  { %v264_v44 = vpop.xlane.xlu0 %263  ;;  %v262_v42 = vpop.xlane.xlu2 %261 }
 0x14d   :  { %v281_v41 = vsub.f32 %v264_v44, %v472_v40  ;;  %v280_v43 = vsub.f32 %v262_v42, %v472_v40 }
 0x14f   :  { %v283_v45 = vmul.f32 %v281_v41, %v281_v41  ;;  %v282_v46 = vmul.f32 %v280_v43, %v280_v43 }
 0x151   :  { %v288_v47 = vsel %vm286_vm13, %v283_v45, 0.0  ;;  %v287_v49 = vsel %vm286_vm13, %v282_v46, 0.0 }
 0x152   :  { %v289_v54 = vadd.f32 %v288_v47, %v287_v49 }
 0x154   :  { %v290_v50 = vrot.slane %v289_v54, 4 }
 0x156   :  { %v291_v51 = vadd.f32 %v290_v50, %v289_v54 }
 0x158   :  { %v292_v52 = vrot.slane %v291_v51, 2 }
 0x15a   :  { %v293_v53 = vadd.f32 %v292_v52, %v291_v51 }
 0x15c   :  { %v294_v55 = vrot.slane %v293_v53, 1 }
 0x15e   :  { %v295_v56 = vadd.f32 %v294_v55, %v293_v53 }
 0x160   :  { %v296_v59 = vmul.f32 0.0625, %v295_v56 }
 0x163   :  { %v425_v40 = vpop.xlane.xlu1 %424 }
 0x164   :  { %v427_v42 = vmul.f32 0.125, %v425_v40 }
 0x167   :  { %v275_v57 = vpop.xlane.xlu2 %274 }
 0x168   :  { %v277_v58 = vmul.f32 0.125, %v275_v57 }
 0x16a   :  { %v433_v60 = vadd.f32 %v296_v59, %v277_v58 }
 0x16c   :  { %435 = vrot.lane.b32.xlu2 %v433_v60, %s577_s0 }
 0x19e   :  { %v311_v61 = vpop.xlane.xlu0 %310 }
 0x19f   :  { %485 = vrcp.f32 %v311_v61  ;;  %v340_v6 = vand.u32 2147483648, %v311_v61  ;;  %vm334_vm15 = vweird.f32 %v311_v61  ;;  %v338_v8 = vand.u32 2147483647, %v311_v61 }
 0x1a1   :  { %v341_v11 = vor.u32 1.1754944e-38, %v340_v6  ;;  %vm339_vm1 = vcmp.eq.f32.partialorder %v338_v8, 8.507059e+37 }
 0x1a4   :  { %v314_v48 = vpop.xlane.xlu2 %313 }
 0x1a5   :  { %v486_v62 = vpop.eup %485  ;;  %487 = vrcp.f32 %v314_v48  ;;  %v355_v12 = vand.u32 2147483648, %v314_v48  ;;  %v353_v14 = vand.u32 2147483647, %v314_v48  ;;  %vm349_vm3 = vweird.f32 %v314_v48 }
 0x1a6   :  { %v330_v63 = vmul.f32 %v486_v62, %v311_v61  ;;  %489 = vlog2.f32 %v311_v61  ;;  %vm335_vm14 = vweird.f32 %v486_v62  ;;  %v325_v20 = vpop.xlane.xlu0 %324 }
 0x1a7   :  { %491 = vlog2.f32 %v314_v48  ;;  %vm336_vm0 = vmor %vm334_vm15, %vm335_vm14  ;;  %v356_v21 = vor.u32 1.1754944e-38, %v355_v12  ;;  %vm354_vm5 = vcmp.eq.f32.partialorder %v353_v14, 8.507059e+37 }
 0x1a8   :  { %v331_v1 = vsub.f32 1.0, %v330_v63 }
 0x1aa   :  { %v332_v39 = vmul.f32 %v486_v62, %v331_v1 }
 0x1ab   :  { %v488_v3 = vpop.eup %487 }
 0x1ac   :  { %v333_v4 = vadd.f32 %v486_v62, %v332_v39  ;;  %v345_v2 = vmul.f32 %v488_v3, %v314_v48  ;;  %v490_v10 = vpop.eup %489  ;;  %vm350_vm2 = vweird.f32 %v488_v3  ;;  %v328_v25 = vpop.xlane.xlu2 %327 }
 0x1ad   :  { %v492_v5 = vpop.eup %491  ;;  %v316_v16 = vmul.f32 0.6931472, %v490_v10  ;;  %vm351_vm4 = vmor %vm349_vm3, %vm350_vm2 }
 0x1ae   :  { %v337_v9 = vsel %vm336_vm0, %v486_v62, %v333_v4  ;;  %v346_v0 = vsub.f32 1.0, %v345_v2  ;;  %v318_v18 = vmul.f32 0.6931472, %v492_v5 }
 0x1af   :  { %v342_v15 = vsel %vm339_vm1, %v341_v11, %v337_v9  ;;  %v319_v27 = vadd.f32 %v316_v16, %v751_v26 }
 0x1b0   :  { %v347_v13 = vmul.f32 %v488_v3, %v346_v0  ;;  %v343_v22 = vmul.f32 %v342_v15, %v325_v20  ;;  %v320_v28 = vadd.f32 %v318_v18, %v755_v29 }
 0x1b2   :  { %v348_v19 = vadd.f32 %v488_v3, %v347_v13  ;;  %v359_v30 = vsub.f32 %v319_v27, %v343_v22 }
 0x1b4   :  { %v352_v23 = vsel %vm351_vm4, %v488_v3, %v348_v19 }
 0x1b5   :  { %v357_v24 = vsel %vm354_vm5, %v356_v21, %v352_v23 }
 0x1b6   :  { %v358_v7 = vmul.f32 %v357_v24, %v328_v25 }
 0x1b8   :  { %v360_v31 = vsub.f32 %v320_v28, %v358_v7 }
 0x1b9   :  { %v430_v44 = vpop.permute.xlu0 %429 }
 0x1ba   :  { %v363_v32 = vadd.f32 %v360_v31, %v359_v30  ;;  %v432_v43 = vsub.f32 %v428_v37, %v430_v44 }
 0x1bc   :  { %v364_v33 = vrot.slane %v363_v32, 4 }
 0x1be   :  { %v365_v34 = vadd.f32 %v364_v33, %v363_v32 }
 0x1c0   :  { %v366_v35 = vrot.slane %v365_v34, 2 }
 0x1c2   :  { %v367_v36 = vadd.f32 %v366_v35, %v365_v34 }
 0x1c4   :  { %v368_v38 = vrot.slane %v367_v36, 1 }
 0x1c6   :  { %v369_v41 = vadd.f32 %v368_v38, %v367_v36  ;;  %v436_v26 = vpop.permute.xlu2 %435 }
 0x1c7   :  { %v438_v47 = vadd.f32 %v436_v26, %v432_v43 }
 0x1c8   :  { %v370_v45 = vmul.f32 0.0625, %v369_v41 }
 0x1ca   :  { %v439_v46 = vsub.f32 %v370_v45, %v427_v42 }
 0x1cc   :  { %v440_v29 = vmul.f32 10.0, %v439_v46 }
 0x1ce   :  { %v441_v49 = vadd.f32 %v440_v29, %v438_v47 }
 0x1d0   :  { %443 = vst.msk [vmem:[#allocation7] sm:$0x1] %vm442_vm6, %v441_v49 }
 0x1d1   :  { %454 = dma.vmem_to_hbm [thread:$0]  %s450_s8, 16, %s452_s11, [#allocation4]  }
 0x1d2   :  { %569 = dma.done.wait [#allocation4], 16  }
 0x1d3   :  { %570 = vsyncadd [#allocation4], 4294967280 }
 0x1d4   :  { %459 = vsyncpa [#allocation3], 1 }
 0x1d5   :  { %460 = vsyncpa [#allocation6], 1 }
 0x1d6   :  { %461 = vsyncpa [#allocation4], 1 }

</bundles_post_ra>
